<compile_context>
chip_gen: v7x
topology: tpu7x:2x2x1
jax: 0.10.0
libtpu: 0.0.40
codegen_flags: <defaults>
</compile_context>

<pallas_src>
import jax
import jax.numpy as jnp
from jax.experimental import pallas as pl
from jax.experimental.pallas import tpu as pltpu

_LANE = 128
_BLOCK_TARGET = 2 * 1024 * 1024   # ~2 MiB per block (HBM-streaming sweet spot)
_MIN_GRID = 8                     # target >= 8 grid steps for medium/large tensors

_NATIVE_BF16 = None


def _has_native_bf16() -> bool:
    """v6e / v7x have bf16 VPU+EUP; v5e (and older) do not. Queried once, outside tracing."""
    global _NATIVE_BF16
    if _NATIVE_BF16 is None:
        try:
            kind = jax.devices()[0].device_kind.lower()
        except Exception:
            kind = ""
        _NATIVE_BF16 = any(tag in kind for tag in ("v6", "v7", "7x"))
    return _NATIVE_BF16


def _make_silu_kernel(compute_dtype):
    def kernel(x_ref, o_ref):
        x = x_ref[...].astype(compute_dtype)
        # Single-transcendental sigmoid: sigmoid(x) == 0.5 * (tanh(0.5*x) + 1).
        sig = 0.5 * (jnp.tanh(x * 0.5) + 1.0)
        o_ref[...] = (x * sig).astype(o_ref.dtype)
    return kernel


def _lane_dense_2d(x: jax.Array) -> jax.Array:
    """Reshape to (rows, cols) with cols a multiple of 128, narrow enough that a
    sublane-aligned row tile fits the block budget (so we never column-tile)."""
    n = x.size
    last = x.shape[-1] if x.ndim >= 1 else 1
    dtype_bytes = jnp.dtype(x.dtype).itemsize
    sub = max(8, 32 // max(1, dtype_bytes))

    if last % _LANE == 0 and last * sub * dtype_bytes <= _BLOCK_TARGET:
        return x.reshape(-1, last)
    # Re-flatten (elementwise op => layout-agnostic) to a narrower lane-dense
    # width dividing the element count; keeps every block contiguous in HBM.
    for c in (4096, 2048, 1024, 512, 256, 128):
        if n % c == 0 and c * sub * dtype_bytes <= _BLOCK_TARGET:
            return x.reshape(n // c, c)
    # Fallback for odd element counts: keep the original last dim (may hit
    # masked stores for tiny / odd last dims; still correct).
    if x.ndim <= 1:
        return x.reshape(1, -1)
    return x.reshape(-1, last)


def _choose_row_tile(rows: int, cols: int, dtype_bytes: int) -> int:
    sub = max(8, 32 // max(1, dtype_bytes))
    if rows <= sub:
        return rows  # full-dim block (allowed by the (8,128) rule)

    # Largest sublane-aligned row tile within the per-block byte budget.
    rt = max(sub, (_BLOCK_TARGET // max(1, cols * dtype_bytes)) // sub * sub)

    # For medium/large tensors, cap the tile so the grid has >= _MIN_GRID steps:
    # keeps in/out DMA overlapped and lets v7x shard across both TensorCores.
    total_bytes = rows * cols * dtype_bytes
    if total_bytes > 2 * _BLOCK_TARGET and rows >= _MIN_GRID * sub:
        cap = max(sub, (rows // _MIN_GRID) // sub * sub)
        rt = min(rt, cap)
    rt = min(rt, rows)

    # Prefer a nearby sublane-aligned tile that evenly divides rows
    # (no straggler block -> no extra grid step / masked partial store).
    if rows % rt != 0:
        cand = rt
        while cand >= max(sub, rt // 2):
            if rows % cand == 0:
                return cand
            cand -= sub
    return rt


def silu(x: jax.Array, *, donate: bool = False) -> jax.Array:
    """SiLU elementwise via a Pallas TPU kernel. Matches torch: x * sigmoid(x)."""
    if x.size == 0:
        return x
    orig_shape = x.shape
    orig_dtype = x.dtype

    x2 = _lane_dense_2d(x)
    rows, cols = x2.shape
    dtype_bytes = jnp.dtype(orig_dtype).itemsize

    row_tile = _choose_row_tile(rows, cols, dtype_bytes)

    # Common path: col_tile == cols => contiguous blocks, no column tiling.
    # Last-resort column tiling only for pathological non-lane-aligned wide rows
    # whose single row slab would blow the VMEM budget.
    col_tile = cols
    if cols > _LANE and row_tile * cols * dtype_bytes > 4 * _BLOCK_TARGET:
        col_tile = max(_LANE, (_BLOCK_TARGET // max(1, row_tile * dtype_bytes)) // _LANE * _LANE)

    grid = (pl.cdiv(rows, row_tile), pl.cdiv(cols, col_tile))

    if orig_dtype == jnp.bfloat16 and _has_native_bf16():
        compute_dtype = jnp.bfloat16   # native bf16 VPU/EUP on v6e/v7x
    else:
        compute_dtype = jnp.float32

    # Modest scoped-VMEM request: 2 buffers each for input + output blocks + margin.
    block_bytes = row_tile * col_tile * dtype_bytes
    vmem_limit = min(128 * 1024 * 1024, max(16 * 1024 * 1024, 4 * block_bytes + 4 * 1024 * 1024))

    out = pl.pallas_call(
        _make_silu_kernel(compute_dtype),
        out_shape=jax.ShapeDtypeStruct((rows, cols), orig_dtype),
        grid_spec=pltpu.PrefetchScalarGridSpec(
            num_scalar_prefetch=0,
            grid=grid,
            in_specs=[pl.BlockSpec((row_tile, col_tile), lambda i, j: (i, j))],
            out_specs=pl.BlockSpec((row_tile, col_tile), lambda i, j: (i, j)),
        ),
        compiler_params=pltpu.CompilerParams(
            dimension_semantics=("parallel", "parallel"),
            vmem_limit_bytes=vmem_limit,
        ),
        input_output_aliases=({0: 0} if donate else {}),
    )(x2)

    return out.reshape(orig_shape)


if __name__ == "__main__":
    key = jax.random.PRNGKey(0)

    # Small llama2-style activation: [batch, seq, hidden]
    x = jax.random.normal(key, (2, 8, 32), dtype=jnp.float32)
    y = silu(x)
    jax.block_until_ready(y)
    y_ref = x * jax.nn.sigmoid(x)
    assert y.shape == x.shape and y.dtype == x.dtype
    assert jnp.allclose(y, y_ref, atol=1e-5, rtol=1e-5), "mismatch vs reference (small f32)"

    # Native lane-dense path (hidden % 128 == 0).
    x2 = jax.random.normal(jax.random.PRNGKey(1), (4, 16, 256), dtype=jnp.float32)
    y2 = silu(x2)
    jax.block_until_ready(y2)
    y2_ref = x2 * jax.nn.sigmoid(x2)
    assert jnp.allclose(y2, y2_ref, atol=1e-5, rtol=1e-5), "mismatch vs reference (128-aligned f32)"

    # bf16 path (bf16-native compute on v6e/v7x, f32 compute elsewhere).
    x3 = jax.random.normal(jax.random.PRNGKey(2), (2, 8, 128), dtype=jnp.bfloat16)
    y3 = silu(x3)
    jax.block_until_ready(y3)
    x3f = x3.astype(jnp.float32)
    y3_ref = x3f * jax.nn.sigmoid(x3f)
    assert y3.dtype == jnp.bfloat16
    assert jnp.allclose(y3.astype(jnp.float32), y3_ref, atol=2e-2, rtol=2e-2), "mismatch vs reference (bf16)"

    print("KERNEL_OK")
</pallas_src>

<mosaic_0001>
module attributes {stable_mosaic.version = 11 : i64} {
  func.func @kernel(%arg0: i32, %arg1: i32, %arg2: memref<1x512xf32, #tpu.memory_space<vmem>>, %arg3: memref<1x512xf32, #tpu.memory_space<vmem>>) attributes {dimension_semantics = [#tpu.dimension_semantics<parallel>, #tpu.dimension_semantics<parallel>], iteration_bounds = array<i64: 1, 1>, scalar_prefetch = 0 : i64, scratch_operands = 0 : i64, tpu.core_type = #tpu.core_type<tc>, window_params = [{transform_indices = @transform_0, window_bounds = array<i64: 1, 512>}, {transform_indices = @transform_1, window_bounds = array<i64: 1, 512>}]} {
    %c0 = arith.constant 0 : index
    %c0_0 = arith.constant 0 : index
    %0 = vector.load %arg2[%c0, %c0_0] : memref<1x512xf32, #tpu.memory_space<vmem>>, vector<1x512xf32>
    %cst = arith.constant 5.000000e-01 : f32
    %1 = vector.broadcast %cst : f32 to vector<1x512xf32>
    %2 = arith.mulf %0, %1 : vector<1x512xf32>
    %3 = math.tanh %2 : vector<1x512xf32>
    %cst_1 = arith.constant 1.000000e+00 : f32
    %4 = vector.broadcast %cst_1 : f32 to vector<1x512xf32>
    %5 = arith.addf %3, %4 : vector<1x512xf32>
    %cst_2 = arith.constant 5.000000e-01 : f32
    %6 = vector.broadcast %cst_2 : f32 to vector<1x512xf32>
    %7 = arith.mulf %6, %5 : vector<1x512xf32>
    %8 = arith.mulf %0, %7 : vector<1x512xf32>
    %c0_3 = arith.constant 0 : index
    %c0_4 = arith.constant 0 : index
    %9 = vector.load %arg3[%c0_3, %c0_4] : memref<1x512xf32, #tpu.memory_space<vmem>>, vector<1x512xf32>
    tpu.vector_store %arg3[%c0_3, %c0_4], %8 {strides = array<i32>} : memref<1x512xf32, #tpu.memory_space<vmem>>, vector<1x512xf32>,
    return
  }
  func.func @transform_0(%arg0: i32, %arg1: i32) -> (i32, i32) {
    %c0_i32 = arith.constant 0 : i32
    return %arg0, %arg1 : i32, i32
  }
  func.func @transform_1(%arg0: i32, %arg1: i32) -> (i32, i32) {
    %c0_i32 = arith.constant 0 : i32
    return %arg0, %arg1 : i32, i32
  }
}

</mosaic_0001>

<bundles_post_ra>
// kernel: tpu_custom_call.1
= control target key start
LH: loop header
LB: loop body
LE: loop exit
PB: predicated region body
PF: predicated region fallthrough
CT: control target
= control target key end

     0   :  { %6 = vsyncpa [#allocation3], 0  ;;  %s135_s0 = inlined_call_operand.hbm [shape: f32[1,512], index: 0, kind: input, shape index: {}]   ;;  %s136_s1 = inlined_call_operand.hbm [shape: f32[1,512], index: 1, kind: output, shape index: {}]  }
   0x1   :  { %7 = vsyncpa [#allocation4], 0  ;;  %s99_s6 = smov [#allocation2]   ;;  %s51_s10 = scalar_lea.hbm %s135_s0, 64 }
   0x2   :  { %s14_s7 = sshll.u32 %s99_s6, 4  ;;  %p52_p0 = scmp.ne.s32.totalorder %s135_s0, %s51_s10  ;;  %s15_s7 = int_to_ptr.vmem [resolvable:$true] %s14_s7 }
   0x3   :  { %p55_p1 = scmp.lt.u32.totalorder %s51_s10, %s135_s0 }
   0x5   :  { %p57_p2 = pnand %p55_p1, %p52_p0 }
   0x7   :  { %60 = shalt.err (!%p57_p2)
}
   0x8   :  { %s61_s15 = scalar_lea.vmem %s15_s7, 64  ;;  %p66_p4 = scmp.lt.s32.totalorder %s15_s7, %s15_s7 }
   0x9   :  { %p62_p3 = scmp.ne.s32.totalorder %s15_s7, %s61_s15  ;;  %p67_p5 = scmp.lt.s32.totalorder %s61_s15, %s61_s15 }
   0xb   :  { %p68_p6 = por %p67_p5, %p66_p4 }
   0xd   :  { %p69_p7 = pnand %p68_p6, %p62_p3 }
   0xf   :  { %72 = shalt.err (!%p69_p7)
}
  0x10   :  { %17 = dma.hbm_to_vmem [thread:$0]  %s135_s0, 64, %s15_s7, [#allocation3]  }
  0x11   :  { %95 = dma.done.wait [#allocation3], 64  }
  0x12   :  { %96 = vsyncadd [#allocation3], 4294967232  ;;  %v21_v0 = vld [vmem:[#allocation2] sm:$0xf]  ;;  %v27_v3 = vlaneseq  ;;  %s100_s18 = smov [#allocation5]  }
  0x13   :  { %v22_v1 = vmul.f32 0.5, %v21_v0  ;;  %s38_s19 = sshll.u32 %s100_s18, 4  ;;  %s39_s19 = int_to_ptr.vmem [resolvable:$true] %s38_s19 }
  0x14   :  { %vm29_vm0 = vcmp.lt.s32.totalorder %v27_v3, 512  ;;  %s73_s20 = scalar_lea.vmem %s39_s19, 64  ;;  %p78_p9 = scmp.lt.s32.totalorder %s39_s19, %s39_s19 }
  0x15   :  { %49 = vtanh.f32 %v22_v1  ;;  %p74_p8 = scmp.ne.s32.totalorder %s39_s19, %s73_s20  ;;  %p79_p10 = scmp.lt.s32.totalorder %s73_s20, %s73_s20 }
  0x17   :  { %p80_p11 = por %p79_p10, %p78_p9 }
  0x19   :  { %p81_p12 = pnand %p80_p11, %p74_p8 }
  0x1f   :  { %v50_v2 = vpop.eup %49 }
  0x20   :  { %v24_v4 = vadd.f32 1.0, %v50_v2 }
  0x22   :  { %v25_v5 = vmul.f32 0.5, %v24_v4 }
  0x24   :  { %v26_v6 = vmul.f32 %v25_v5, %v21_v0 }
  0x26   :  { %31 = vst.msk [vmem:[#allocation5] sm:$0xf] %vm29_vm0, %v26_v6 }
  0x27   :  { %84 = shalt.err (!%p81_p12)
}
  0x28   :  { %s85_s22 = scalar_lea.hbm %s136_s1, 64 }
  0x29   :  { %p86_p13 = scmp.ne.s32.totalorder %s136_s1, %s85_s22  ;;  %p89_p0 = scmp.lt.u32.totalorder %s85_s22, %s136_s1 }
  0x2b   :  { %p91_p1 = pnand %p89_p0, %p86_p13 }
  0x2d   :  { %94 = shalt.err (!%p91_p1)
}
  0x2e   :  { %41 = dma.vmem_to_hbm [thread:$0]  %s39_s19, 64, %s136_s1, [#allocation4]  }
  0x2f   :  { %97 = dma.done.wait [#allocation4], 64  }
  0x30   :  { %98 = vsyncadd [#allocation4], 4294967232 }
  0x31   :  { %45 = vsyncpa [#allocation3], 1 }
  0x32   :  { %46 = vsyncpa [#allocation4], 1 }

</bundles_post_ra>
